<compile_context>
chip_gen: v6e
topology: v6e:2x2x1
jax: 0.10.0
libtpu: 0.0.40
codegen_flags: <defaults>
</compile_context>

<pallas_src>
import functools

import jax
import jax.numpy as jnp
from jax.experimental import pallas as pl
from jax.experimental.pallas import tpu as pltpu


def _round_up(x, m):
    return ((x + m - 1) // m) * m


def _sigmoid(x):
    # sigmoid(x) == 0.5*(1 + tanh(x/2)); one EUP transcendental per pass.
    return 0.5 * (jnp.tanh(0.5 * x) + 1.0)


def lstm_chunk_kernel(x_ref, wih_ref, whh_ref, b_ref, fcw_ref, fcb_ref,
                      out_ref, h_sc, c_sc, gx_sc, *,
                      seq_len, t_blk, batch, hidden):
    """One grid step == T_BLK LSTM time steps.

    x_ref  : (T_BLK*B, I)  time-major input rows for this chunk
    wih_ref: (I, 4H)       W_ih^T, packed gate order i|f|g|o
    whh_ref: (H, 4H)       W_hh^T, packed
    b_ref  : (1, 4H)       b_ih + b_hh, packed
    fcw_ref: (H, Op)       fc.weight^T, zero-padded columns to Op
    fcb_ref: (1, Op)       fc.bias, zero-padded
    out_ref: (B, Op)       lane-dense output slab (written on last chunk)
    h_sc, c_sc: (B, H)     f32 carries across grid iterations
    gx_sc : (T_BLK*B, 4H)  chunk input projection scratch
    """
    tb = pl.program_id(0)
    hd = hidden

    @pl.when(tb == 0)
    def _():
        # h0 = c0 = zeros, as in the PyTorch forward.
        h_sc[...] = jnp.zeros_like(h_sc)
        c_sc[...] = jnp.zeros_like(c_sc)

    # Fused input projection for the whole chunk: one MXU GEMM, time-major rows.
    gx_sc[...] = (jnp.dot(x_ref[...].astype(wih_ref.dtype), wih_ref[...],
                          preferred_element_type=jnp.float32)
                  + b_ref[...])

    h = h_sc[...]
    c = c_sc[...]
    needs_mask = (seq_len % t_blk) != 0

    # Serial recurrence over the chunk (static unroll; live ranges bounded by
    # the grid-step boundary).
    for t in range(t_blk):
        gates = gx_sc[t * batch:(t + 1) * batch, :] + jnp.dot(
            h.astype(whh_ref.dtype), whh_ref[...],
            preferred_element_type=jnp.float32)          # (B, 4H), packed
        # One full-vreg sigmoid covers i,f,o; one full-vreg tanh covers g.
        sg = _sigmoid(gates)
        tg = jnp.tanh(gates)
        i = sg[:, 0 * hd:1 * hd]
        f = sg[:, 1 * hd:2 * hd]
        g = tg[:, 2 * hd:3 * hd]
        o = sg[:, 3 * hd:4 * hd]
        c_new = f * c + i * g
        h_new = o * jnp.tanh(c_new)
        if needs_mask:
            valid = (tb * t_blk + t) < seq_len           # tail-step mask
            h = jnp.where(valid, h_new, h)
            c = jnp.where(valid, c_new, c)
        else:
            h, c = h_new, c_new

    h_sc[...] = h
    c_sc[...] = c

    @pl.when(tb == pl.num_programs(0) - 1)
    def _():
        # out = fc(dropout(relu(h_last))); dropout p=0.0 -> identity.
        relu_h = jnp.maximum(h, 0.0)
        out_ref[...] = (jnp.dot(relu_h.astype(fcw_ref.dtype), fcw_ref[...],
                                preferred_element_type=jnp.float32)
                        + fcb_ref[...]).astype(out_ref.dtype)


def prepare_params(params, weights_dtype=jnp.float32):
    """One-time weight packing (hoisted out of the per-call forward)."""
    H = params["w_hh"].shape[1]
    O = params["fc_w"].shape[0]
    Op = _round_up(O, 128)
    return {
        "w_ih_t": params["w_ih"].T.astype(weights_dtype),              # (I, 4H)
        "w_hh_t": params["w_hh"].T.astype(weights_dtype),              # (H, 4H)
        "bias": (params["b_ih"] + params["b_hh"]).reshape(1, 4 * H)
                .astype(jnp.float32),                                  # (1, 4H)
        "fc_w_t": jnp.pad(params["fc_w"].T, ((0, 0), (0, Op - O)))
                  .astype(weights_dtype),                              # (H, Op)
        "fc_b": jnp.pad(params["fc_b"], (0, Op - O)).reshape(1, Op)
                .astype(jnp.float32),                                  # (1, Op)
    }


@functools.partial(jax.jit, static_argnames=("out_size",))
def lstm_net_forward(x, packed, out_size):
    """x: (B, S, I) float32, batch-first like the PyTorch module."""
    B, S, I = x.shape
    G = packed["w_ih_t"].shape[1]          # packed gate width = 4H
    H = G // 4
    Op = packed["fc_w_t"].shape[1]

    Bp = _round_up(B, 8)                   # sublane-aligned batch
    T_BLK = max(1, min(32, S))             # time chunk per grid step
    n_chunks = pl.cdiv(S, T_BLK)
    S_pad = n_chunks * T_BLK

    # Time-major x (tiny relative to gates_x), zero-padded tail / batch rows.
    x_tm = jnp.transpose(x, (1, 0, 2))                     # (S, B, I)
    if (S_pad, Bp) != (S, B):
        x_tm = jnp.pad(x_tm, ((0, S_pad - S), (0, Bp - B), (0, 0)))
    x2d = x_tm.reshape(S_pad * Bp, I)

    kernel = functools.partial(
        lstm_chunk_kernel, seq_len=S, t_blk=T_BLK, batch=Bp, hidden=H)

    grid_spec = pltpu.PrefetchScalarGridSpec(
        num_scalar_prefetch=0,
        grid=(n_chunks,),
        in_specs=[
            pl.BlockSpec((T_BLK * Bp, I), lambda t: (t, 0)),   # x chunk
            pl.BlockSpec((I, G), lambda t: (0, 0)),            # W_ih^T
            pl.BlockSpec((H, G), lambda t: (0, 0)),            # W_hh^T
            pl.BlockSpec((1, G), lambda t: (0, 0)),            # bias
            pl.BlockSpec((H, Op), lambda t: (0, 0)),           # fc W^T
            pl.BlockSpec((1, Op), lambda t: (0, 0)),           # fc bias
        ],
        out_specs=pl.BlockSpec((Bp, Op), lambda t: (0, 0)),
        scratch_shapes=[
            pltpu.VMEM((Bp, H), jnp.float32),                  # h carry
            pltpu.VMEM((Bp, H), jnp.float32),                  # c carry
            pltpu.VMEM((T_BLK * Bp, G), jnp.float32),          # chunk gates_x
        ],
    )

    cost = pl.CostEstimate(
        flops=(2 * S_pad * Bp * I * G            # input projection
               + 2 * S_pad * Bp * H * G          # recurrence
               + 2 * Bp * H * Op),               # fc
        transcendentals=3 * S_pad * Bp * G,
        bytes_accessed=(x2d.size * 4
                        + sum(packed[k].size * packed[k].dtype.itemsize
                              for k in ("w_ih_t", "w_hh_t", "bias",
                                        "fc_w_t", "fc_b"))
                        + Bp * Op * 4),
    )

    out_padded = pl.pallas_call(
        kernel,
        out_shape=jax.ShapeDtypeStruct((Bp, Op), x.dtype),
        grid_spec=grid_spec,
        compiler_params=pltpu.CompilerParams(
            dimension_semantics=("arbitrary",),      # serial recurrence
            vmem_limit_bytes=32 * 1024 * 1024),
        cost_estimate=cost,
    )(x2d, packed["w_ih_t"], packed["w_hh_t"], packed["bias"],
      packed["fc_w_t"], packed["fc_b"])

    return out_padded[:B, :out_size]


def lstm_net_reference(x, params):
    """Pure-JAX reference matching PyTorch nn.LSTM semantics."""
    B, S, _ = x.shape
    H = params["w_hh"].shape[1]
    w_ih, w_hh = params["w_ih"], params["w_hh"]
    b = params["b_ih"] + params["b_hh"]
    h = jnp.zeros((B, H), jnp.float32)
    c = jnp.zeros((B, H), jnp.float32)
    for t in range(S):
        gates = x[:, t, :] @ w_ih.T + h @ w_hh.T + b
        i = jax.nn.sigmoid(gates[:, :H])
        f = jax.nn.sigmoid(gates[:, H:2 * H])
        g = jnp.tanh(gates[:, 2 * H:3 * H])
        o = jax.nn.sigmoid(gates[:, 3 * H:])
        c = f * c + i * g
        h = o * jnp.tanh(c)
    return jnp.maximum(h, 0.0) @ params["fc_w"].T + params["fc_b"]


def init_params(key, input_size, hidden_size, output_size):
    """Deterministic init mimicking PyTorch's U(-1/sqrt(H), 1/sqrt(H))."""
    k = 1.0 / jnp.sqrt(jnp.float32(hidden_size))
    ks = jax.random.split(key, 6)
    u = lambda kk, shape: jax.random.uniform(kk, shape, jnp.float32, -k, k)
    return {
        "w_ih": u(ks[0], (4 * hidden_size, input_size)),
        "w_hh": u(ks[1], (4 * hidden_size, hidden_size)),
        "b_ih": u(ks[2], (4 * hidden_size,)),
        "b_hh": u(ks[3], (4 * hidden_size,)),
        "fc_w": u(ks[4], (output_size, hidden_size)),
        "fc_b": u(ks[5], (output_size,)),
    }


if __name__ == "__main__":
    B, S, I, H, O = 8, 8, 16, 32, 8

    key = jax.random.PRNGKey(0)
    k_x, k_p = jax.random.split(key)
    x = jax.random.normal(k_x, (B, S, I), jnp.float32)
    params = init_params(k_p, I, H, O)
    packed = prepare_params(params)          # one-time weight packing

    out = jax.block_until_ready(lstm_net_forward(x, packed, out_size=O))
    ref = jax.block_until_ready(lstm_net_reference(x, params))

    assert out.shape == (B, O)
    assert jnp.allclose(out, ref, atol=2e-4, rtol=2e-4), (
        f"max abs err {jnp.max(jnp.abs(out - ref))}")
    print("KERNEL_OK")
</pallas_src>

<mosaic_0001>
module attributes {stable_mosaic.version = 11 : i64} {
  func.func @lstm_chunk_kernel(%arg0: i32, %arg1: memref<64x16xf32, #tpu.memory_space<vmem>>, %arg2: memref<16x128xf32, #tpu.memory_space<vmem>>, %arg3: memref<32x128xf32, #tpu.memory_space<vmem>>, %arg4: memref<1x128xf32, #tpu.memory_space<vmem>>, %arg5: memref<32x128xf32, #tpu.memory_space<vmem>>, %arg6: memref<1x128xf32, #tpu.memory_space<vmem>>, %arg7: memref<8x128xf32, #tpu.memory_space<vmem>>, %arg8: memref<8x32xf32, #tpu.memory_space<vmem>>, %arg9: memref<8x32xf32, #tpu.memory_space<vmem>>, %arg10: memref<64x128xf32, #tpu.memory_space<vmem>>) attributes {dimension_semantics = [#tpu.dimension_semantics<arbitrary>], iteration_bounds = array<i64: 1>, scalar_prefetch = 0 : i64, scratch_operands = 3 : i64, tpu.core_type = #tpu.core_type<tc>, window_params = [{transform_indices = @transform_0, window_bounds = array<i64: 64, 16>}, {pipeline_mode = #tpu.pipeline_mode<synchronous>, transform_indices = @transform_1, window_bounds = array<i64: 16, 128>}, {pipeline_mode = #tpu.pipeline_mode<synchronous>, transform_indices = @transform_2, window_bounds = array<i64: 32, 128>}, {pipeline_mode = #tpu.pipeline_mode<synchronous>, transform_indices = @transform_3, window_bounds = array<i64: 1, 128>}, {pipeline_mode = #tpu.pipeline_mode<synchronous>, transform_indices = @transform_4, window_bounds = array<i64: 32, 128>}, {pipeline_mode = #tpu.pipeline_mode<synchronous>, transform_indices = @transform_5, window_bounds = array<i64: 1, 128>}, {pipeline_mode = #tpu.pipeline_mode<synchronous>, transform_indices = @transform_6, window_bounds = array<i64: 8, 128>}]} {
    %c0_i32 = arith.constant 0 : i32
    %0 = arith.cmpi eq, %arg0, %c0_i32 : i32
    %1 = arith.extui %0 : i1 to i32
    %c0_i32_0 = arith.constant 0 : i32
    %2 = arith.cmpi ne, %1, %c0_i32_0 : i32
    scf.if %2 {
      %cst_75 = arith.constant 0.000000e+00 : f32
      %185 = vector.broadcast %cst_75 : f32 to vector<8x32xf32>
      %c0_76 = arith.constant 0 : index
      %c0_77 = arith.constant 0 : index
      %186 = vector.load %arg8[%c0_76, %c0_77] : memref<8x32xf32, #tpu.memory_space<vmem>>, vector<8x32xf32>
      tpu.vector_store %arg8[%c0_76, %c0_77], %185 {strides = array<i32>} : memref<8x32xf32, #tpu.memory_space<vmem>>, vector<8x32xf32>,
      %cst_78 = arith.constant 0.000000e+00 : f32
      %187 = vector.broadcast %cst_78 : f32 to vector<8x32xf32>
      %c0_79 = arith.constant 0 : index
      %c0_80 = arith.constant 0 : index
      %188 = vector.load %arg9[%c0_79, %c0_80] : memref<8x32xf32, #tpu.memory_space<vmem>>, vector<8x32xf32>
      tpu.vector_store %arg9[%c0_79, %c0_80], %187 {strides = array<i32>} : memref<8x32xf32, #tpu.memory_space<vmem>>, vector<8x32xf32>,
    } else {
    }
    %c0 = arith.constant 0 : index
    %c0_1 = arith.constant 0 : index
    %3 = vector.load %arg1[%c0, %c0_1] : memref<64x16xf32, #tpu.memory_space<vmem>>, vector<64x16xf32>
    %c0_2 = arith.constant 0 : index
    %c0_3 = arith.constant 0 : index
    %4 = vector.load %arg2[%c0_2, %c0_3] : memref<16x128xf32, #tpu.memory_space<vmem>>, vector<16x128xf32>
    %cst = arith.constant dense<0.000000e+00> : vector<64x128xf32>
    %5 = tpu.matmul %3, %4, %cst {dimension_numbers = #tpu.dot_dimension_numbers<[1], [0], [0], [1], [0, 0, 1, 1], [], []>} : vector<64x16xf32>, vector<16x128xf32>, vector<64x128xf32> -> vector<64x128xf32>
    %c0_4 = arith.constant 0 : index
    %c0_5 = arith.constant 0 : index
    %6 = vector.load %arg4[%c0_4, %c0_5] : memref<1x128xf32, #tpu.memory_space<vmem>>, vector<1x128xf32>
    %7 = vector.broadcast %6 : vector<1x128xf32> to vector<64x128xf32>
    %8 = arith.addf %5, %7 : vector<64x128xf32>
    %c0_6 = arith.constant 0 : index
    %c0_7 = arith.constant 0 : index
    %9 = vector.load %arg10[%c0_6, %c0_7] : memref<64x128xf32, #tpu.memory_space<vmem>>, vector<64x128xf32>
    tpu.vector_store %arg10[%c0_6, %c0_7], %8 {strides = array<i32>} : memref<64x128xf32, #tpu.memory_space<vmem>>, vector<64x128xf32>,
    %c0_8 = arith.constant 0 : index
    %c0_9 = arith.constant 0 : index
    %10 = vector.load %arg8[%c0_8, %c0_9] : memref<8x32xf32, #tpu.memory_space<vmem>>, vector<8x32xf32>
    %c0_10 = arith.constant 0 : index
    %c0_11 = arith.constant 0 : index
    %11 = vector.load %arg9[%c0_10, %c0_11] : memref<8x32xf32, #tpu.memory_space<vmem>>, vector<8x32xf32>
    %c0_12 = arith.constant 0 : index
    %c0_13 = arith.constant 0 : index
    %12 = vector.load %arg10[%c0_12, %c0_13] : memref<64x128xf32, #tpu.memory_space<vmem>>, vector<8x128xf32>
    %c0_14 = arith.constant 0 : index
    %c0_15 = arith.constant 0 : index
    %13 = vector.load %arg3[%c0_14, %c0_15] : memref<32x128xf32, #tpu.memory_space<vmem>>, vector<32x128xf32>
    %cst_16 = arith.constant dense<0.000000e+00> : vector<8x128xf32>
    %14 = tpu.matmul %10, %13, %cst_16 {dimension_numbers = #tpu.dot_dimension_numbers<[1], [0], [0], [1], [0, 0, 1, 1], [], []>} : vector<8x32xf32>, vector<32x128xf32>, vector<8x128xf32> -> vector<8x128xf32>
    %15 = arith.addf %12, %14 : vector<8x128xf32>
    %cst_17 = arith.constant 5.000000e-01 : f32
    %16 = vector.broadcast %cst_17 : f32 to vector<8x128xf32>
    %17 = arith.mulf %16, %15 : vector<8x128xf32>
    %18 = math.tanh %17 : vector<8x128xf32>
    %cst_18 = arith.constant 1.000000e+00 : f32
    %19 = vector.broadcast %cst_18 : f32 to vector<8x128xf32>
    %20 = arith.addf %18, %19 : vector<8x128xf32>
    %cst_19 = arith.constant 5.000000e-01 : f32
    %21 = vector.broadcast %cst_19 : f32 to vector<8x128xf32>
    %22 = arith.mulf %21, %20 : vector<8x128xf32>
    %23 = math.tanh %15 : vector<8x128xf32>
    %24 = vector.extract_strided_slice %22 {offsets = [0, 0], sizes = [8, 32], strides = [1, 1]} : vector<8x128xf32> to vector<8x32xf32>
    %25 = vector.extract_strided_slice %22 {offsets = [0, 32], sizes = [8, 32], strides = [1, 1]} : vector<8x128xf32> to vector<8x32xf32>
    %26 = vector.extract_strided_slice %23 {offsets = [0, 64], sizes = [8, 32], strides = [1, 1]} : vector<8x128xf32> to vector<8x32xf32>
    %27 = vector.extract_strided_slice %22 {offsets = [0, 96], sizes = [8, 32], strides = [1, 1]} : vector<8x128xf32> to vector<8x32xf32>
    %28 = arith.mulf %25, %11 : vector<8x32xf32>
    %29 = arith.mulf %24, %26 : vector<8x32xf32>
    %30 = arith.addf %28, %29 : vector<8x32xf32>
    %31 = math.tanh %30 : vector<8x32xf32>
    %32 = arith.mulf %27, %31 : vector<8x32xf32>
    %c8 = arith.constant 8 : index
    %c0_20 = arith.constant 0 : index
    %33 = vector.load %arg10[%c8, %c0_20] : memref<64x128xf32, #tpu.memory_space<vmem>>, vector<8x128xf32>
    %c0_21 = arith.constant 0 : index
    %c0_22 = arith.constant 0 : index
    %34 = vector.load %arg3[%c0_21, %c0_22] : memref<32x128xf32, #tpu.memory_space<vmem>>, vector<32x128xf32>
    %cst_23 = arith.constant dense<0.000000e+00> : vector<8x128xf32>
    %35 = tpu.matmul %32, %34, %cst_23 {dimension_numbers = #tpu.dot_dimension_numbers<[1], [0], [0], [1], [0, 0, 1, 1], [], []>} : vector<8x32xf32>, vector<32x128xf32>, vector<8x128xf32> -> vector<8x128xf32>
    %36 = arith.addf %33, %35 : vector<8x128xf32>
    %cst_24 = arith.constant 5.000000e-01 : f32
    %37 = vector.broadcast %cst_24 : f32 to vector<8x128xf32>
    %38 = arith.mulf %37, %36 : vector<8x128xf32>
    %39 = math.tanh %38 : vector<8x128xf32>
    %cst_25 = arith.constant 1.000000e+00 : f32
    %40 = vector.broadcast %cst_25 : f32 to vector<8x128xf32>
    %41 = arith.addf %39, %40 : vector<8x128xf32>
    %cst_26 = arith.constant 5.000000e-01 : f32
    %42 = vector.broadcast %cst_26 : f32 to vector<8x128xf32>
    %43 = arith.mulf %42, %41 : vector<8x128xf32>
    %44 = math.tanh %36 : vector<8x128xf32>
    %45 = vector.extract_strided_slice %43 {offsets = [0, 0], sizes = [8, 32], strides = [1, 1]} : vector<8x128xf32> to vector<8x32xf32>
    %46 = vector.extract_strided_slice %43 {offsets = [0, 32], sizes = [8, 32], strides = [1, 1]} : vector<8x128xf32> to vector<8x32xf32>
    %47 = vector.extract_strided_slice %44 {offsets = [0, 64], sizes = [8, 32], strides = [1, 1]} : vector<8x128xf32> to vector<8x32xf32>
    %48 = vector.extract_strided_slice %43 {offsets = [0, 96], sizes = [8, 32], strides = [1, 1]} : vector<8x128xf32> to vector<8x32xf32>
    %49 = arith.mulf %46, %30 : vector<8x32xf32>
    %50 = arith.mulf %45, %47 : vector<8x32xf32>
    %51 = arith.addf %49, %50 : vector<8x32xf32>
    %52 = math.tanh %51 : vector<8x32xf32>
    %53 = arith.mulf %48, %52 : vector<8x32xf32>
    %c16 = arith.constant 16 : index
    %c0_27 = arith.constant 0 : index
    %54 = vector.load %arg10[%c16, %c0_27] : memref<64x128xf32, #tpu.memory_space<vmem>>, vector<8x128xf32>
    %c0_28 = arith.constant 0 : index
    %c0_29 = arith.constant 0 : index
    %55 = vector.load %arg3[%c0_28, %c0_29] : memref<32x128xf32, #tpu.memory_space<vmem>>, vector<32x128xf32>
    %cst_30 = arith.constant dense<0.000000e+00> : vector<8x128xf32>
    %56 = tpu.matmul %53, %55, %cst_30 {dimension_numbers = #tpu.dot_dimension_numbers<[1], [0], [0], [1], [0, 0, 1, 1], [], []>} : vector<8x32xf32>, vector<32x128xf32>, vector<8x128xf32> -> vector<8x128xf32>
    %57 = arith.addf %54, %56 : vector<8x128xf32>
    %cst_31 = arith.constant 5.000000e-01 : f32
    %58 = vector.broadcast %cst_31 : f32 to vector<8x128xf32>
    %59 = arith.mulf %58, %57 : vector<8x128xf32>
    %60 = math.tanh %59 : vector<8x128xf32>
    %cst_32 = arith.constant 1.000000e+00 : f32
    %61 = vector.broadcast %cst_32 : f32 to vector<8x128xf32>
    %62 = arith.addf %60, %61 : vector<8x128xf32>
    %cst_33 = arith.constant 5.000000e-01 : f32
    %63 = vector.broadcast %cst_33 : f32 to vector<8x128xf32>
    %64 = arith.mulf %63, %62 : vector<8x128xf32>
    %65 = math.tanh %57 : vector<8x128xf32>
    %66 = vector.extract_strided_slice %64 {offsets = [0, 0], sizes = [8, 32], strides = [1, 1]} : vector<8x128xf32> to vector<8x32xf32>
    %67 = vector.extract_strided_slice %64 {offsets = [0, 32], sizes = [8, 32], strides = [1, 1]} : vector<8x128xf32> to vector<8x32xf32>
    %68 = vector.extract_strided_slice %65 {offsets = [0, 64], sizes = [8, 32], strides = [1, 1]} : vector<8x128xf32> to vector<8x32xf32>
    %69 = vector.extract_strided_slice %64 {offsets = [0, 96], sizes = [8, 32], strides = [1, 1]} : vector<8x128xf32> to vector<8x32xf32>
    %70 = arith.mulf %67, %51 : vector<8x32xf32>
    %71 = arith.mulf %66, %68 : vector<8x32xf32>
    %72 = arith.addf %70, %71 : vector<8x32xf32>
    %73 = math.tanh %72 : vector<8x32xf32>
    %74 = arith.mulf %69, %73 : vector<8x32xf32>
    %c24 = arith.constant 24 : index
    %c0_34 = arith.constant 0 : index
    %75 = vector.load %arg10[%c24, %c0_34] : memref<64x128xf32, #tpu.memory_space<vmem>>, vector<8x128xf32>
    %c0_35 = arith.constant 0 : index
    %c0_36 = arith.constant 0 : index
    %76 = vector.load %arg3[%c0_35, %c0_36] : memref<32x128xf32, #tpu.memory_space<vmem>>, vector<32x128xf32>
    %cst_37 = arith.constant dense<0.000000e+00> : vector<8x128xf32>
    %77 = tpu.matmul %74, %76, %cst_37 {dimension_numbers = #tpu.dot_dimension_numbers<[1], [0], [0], [1], [0, 0, 1, 1], [], []>} : vector<8x32xf32>, vector<32x128xf32>, vector<8x128xf32> -> vector<8x128xf32>
    %78 = arith.addf %75, %77 : vector<8x128xf32>
    %cst_38 = arith.constant 5.000000e-01 : f32
    %79 = vector.broadcast %cst_38 : f32 to vector<8x128xf32>
    %80 = arith.mulf %79, %78 : vector<8x128xf32>
    %81 = math.tanh %80 : vector<8x128xf32>
    %cst_39 = arith.constant 1.000000e+00 : f32
    %82 = vector.broadcast %cst_39 : f32 to vector<8x128xf32>
    %83 = arith.addf %81, %82 : vector<8x128xf32>
    %cst_40 = arith.constant 5.000000e-01 : f32
    %84 = vector.broadcast %cst_40 : f32 to vector<8x128xf32>
    %85 = arith.mulf %84, %83 : vector<8x128xf32>
    %86 = math.tanh %78 : vector<8x128xf32>
    %87 = vector.extract_strided_slice %85 {offsets = [0, 0], sizes = [8, 32], strides = [1, 1]} : vector<8x128xf32> to vector<8x32xf32>
    %88 = vector.extract_strided_slice %85 {offsets = [0, 32], sizes = [8, 32], strides = [1, 1]} : vector<8x128xf32> to vector<8x32xf32>
    %89 = vector.extract_strided_slice %86 {offsets = [0, 64], sizes = [8, 32], strides = [1, 1]} : vector<8x128xf32> to vector<8x32xf32>
    %90 = vector.extract_strided_slice %85 {offsets = [0, 96], sizes = [8, 32], strides = [1, 1]} : vector<8x128xf32> to vector<8x32xf32>
    %91 = arith.mulf %88, %72 : vector<8x32xf32>
    %92 = arith.mulf %87, %89 : vector<8x32xf32>
    %93 = arith.addf %91, %92 : vector<8x32xf32>
    %94 = math.tanh %93 : vector<8x32xf32>
    %95 = arith.mulf %90, %94 : vector<8x32xf32>
    %c32 = arith.constant 32 : index
    %c0_41 = arith.constant 0 : index
    %96 = vector.load %arg10[%c32, %c0_41] : memref<64x128xf32, #tpu.memory_space<vmem>>, vector<8x128xf32>
    %c0_42 = arith.constant 0 : index
    %c0_43 = arith.constant 0 : index
    %97 = vector.load %arg3[%c0_42, %c0_43] : memref<32x128xf32, #tpu.memory_space<vmem>>, vector<32x128xf32>
    %cst_44 = arith.constant dense<0.000000e+00> : vector<8x128xf32>
    %98 = tpu.matmul %95, %97, %cst_44 {dimension_numbers = #tpu.dot_dimension_numbers<[1], [0], [0], [1], [0, 0, 1, 1], [], []>} : vector<8x32xf32>, vector<32x128xf32>, vector<8x128xf32> -> vector<8x128xf32>
    %99 = arith.addf %96, %98 : vector<8x128xf32>
    %cst_45 = arith.constant 5.000000e-01 : f32
    %100 = vector.broadcast %cst_45 : f32 to vector<8x128xf32>
    %101 = arith.mulf %100, %99 : vector<8x128xf32>
    %102 = math.tanh %101 : vector<8x128xf32>
    %cst_46 = arith.constant 1.000000e+00 : f32
    %103 = vector.broadcast %cst_46 : f32 to vector<8x128xf32>
    %104 = arith.addf %102, %103 : vector<8x128xf32>
    %cst_47 = arith.constant 5.000000e-01 : f32
    %105 = vector.broadcast %cst_47 : f32 to vector<8x128xf32>
    %106 = arith.mulf %105, %104 : vector<8x128xf32>
    %107 = math.tanh %99 : vector<8x128xf32>
    %108 = vector.extract_strided_slice %106 {offsets = [0, 0], sizes = [8, 32], strides = [1, 1]} : vector<8x128xf32> to vector<8x32xf32>
    %109 = vector.extract_strided_slice %106 {offsets = [0, 32], sizes = [8, 32], strides = [1, 1]} : vector<8x128xf32> to vector<8x32xf32>
    %110 = vector.extract_strided_slice %107 {offsets = [0, 64], sizes = [8, 32], strides = [1, 1]} : vector<8x128xf32> to vector<8x32xf32>
    %111 = vector.extract_strided_slice %106 {offsets = [0, 96], sizes = [8, 32], strides = [1, 1]} : vector<8x128xf32> to vector<8x32xf32>
    %112 = arith.mulf %109, %93 : vector<8x32xf32>
    %113 = arith.mulf %108, %110 : vector<8x32xf32>
    %114 = arith.addf %112, %113 : vector<8x32xf32>
    %115 = math.tanh %114 : vector<8x32xf32>
    %116 = arith.mulf %111, %115 : vector<8x32xf32>
    %c40 = arith.constant 40 : index
    %c0_48 = arith.constant 0 : index
    %117 = vector.load %arg10[%c40, %c0_48] : memref<64x128xf32, #tpu.memory_space<vmem>>, vector<8x128xf32>
    %c0_49 = arith.constant 0 : index
    %c0_50 = arith.constant 0 : index
    %118 = vector.load %arg3[%c0_49, %c0_50] : memref<32x128xf32, #tpu.memory_space<vmem>>, vector<32x128xf32>
    %cst_51 = arith.constant dense<0.000000e+00> : vector<8x128xf32>
    %119 = tpu.matmul %116, %118, %cst_51 {dimension_numbers = #tpu.dot_dimension_numbers<[1], [0], [0], [1], [0, 0, 1, 1], [], []>} : vector<8x32xf32>, vector<32x128xf32>, vector<8x128xf32> -> vector<8x128xf32>
    %120 = arith.addf %117, %119 : vector<8x128xf32>
    %cst_52 = arith.constant 5.000000e-01 : f32
    %121 = vector.broadcast %cst_52 : f32 to vector<8x128xf32>
    %122 = arith.mulf %121, %120 : vector<8x128xf32>
    %123 = math.tanh %122 : vector<8x128xf32>
    %cst_53 = arith.constant 1.000000e+00 : f32
    %124 = vector.broadcast %cst_53 : f32 to vector<8x128xf32>
    %125 = arith.addf %123, %124 : vector<8x128xf32>
    %cst_54 = arith.constant 5.000000e-01 : f32
    %126 = vector.broadcast %cst_54 : f32 to vector<8x128xf32>
    %127 = arith.mulf %126, %125 : vector<8x128xf32>
    %128 = math.tanh %120 : vector<8x128xf32>
    %129 = vector.extract_strided_slice %127 {offsets = [0, 0], sizes = [8, 32], strides = [1, 1]} : vector<8x128xf32> to vector<8x32xf32>
    %130 = vector.extract_strided_slice %127 {offsets = [0, 32], sizes = [8, 32], strides = [1, 1]} : vector<8x128xf32> to vector<8x32xf32>
    %131 = vector.extract_strided_slice %128 {offsets = [0, 64], sizes = [8, 32], strides = [1, 1]} : vector<8x128xf32> to vector<8x32xf32>
    %132 = vector.extract_strided_slice %127 {offsets = [0, 96], sizes = [8, 32], strides = [1, 1]} : vector<8x128xf32> to vector<8x32xf32>
    %133 = arith.mulf %130, %114 : vector<8x32xf32>
    %134 = arith.mulf %129, %131 : vector<8x32xf32>
    %135 = arith.addf %133, %134 : vector<8x32xf32>
    %136 = math.tanh %135 : vector<8x32xf32>
    %137 = arith.mulf %132, %136 : vector<8x32xf32>
    %c48 = arith.constant 48 : index
    %c0_55 = arith.constant 0 : index
    %138 = vector.load %arg10[%c48, %c0_55] : memref<64x128xf32, #tpu.memory_space<vmem>>, vector<8x128xf32>
    %c0_56 = arith.constant 0 : index
    %c0_57 = arith.constant 0 : index
    %139 = vector.load %arg3[%c0_56, %c0_57] : memref<32x128xf32, #tpu.memory_space<vmem>>, vector<32x128xf32>
    %cst_58 = arith.constant dense<0.000000e+00> : vector<8x128xf32>
    %140 = tpu.matmul %137, %139, %cst_58 {dimension_numbers = #tpu.dot_dimension_numbers<[1], [0], [0], [1], [0, 0, 1, 1], [], []>} : vector<8x32xf32>, vector<32x128xf32>, vector<8x128xf32> -> vector<8x128xf32>
    %141 = arith.addf %138, %140 : vector<8x128xf32>
    %cst_59 = arith.constant 5.000000e-01 : f32
    %142 = vector.broadcast %cst_59 : f32 to vector<8x128xf32>
    %143 = arith.mulf %142, %141 : vector<8x128xf32>
    %144 = math.tanh %143 : vector<8x128xf32>
    %cst_60 = arith.constant 1.000000e+00 : f32
    %145 = vector.broadcast %cst_60 : f32 to vector<8x128xf32>
    %146 = arith.addf %144, %145 : vector<8x128xf32>
    %cst_61 = arith.constant 5.000000e-01 : f32
    %147 = vector.broadcast %cst_61 : f32 to vector<8x128xf32>
    %148 = arith.mulf %147, %146 : vector<8x128xf32>
    %149 = math.tanh %141 : vector<8x128xf32>
    %150 = vector.extract_strided_slice %148 {offsets = [0, 0], sizes = [8, 32], strides = [1, 1]} : vector<8x128xf32> to vector<8x32xf32>
    %151 = vector.extract_strided_slice %148 {offsets = [0, 32], sizes = [8, 32], strides = [1, 1]} : vector<8x128xf32> to vector<8x32xf32>
    %152 = vector.extract_strided_slice %149 {offsets = [0, 64], sizes = [8, 32], strides = [1, 1]} : vector<8x128xf32> to vector<8x32xf32>
    %153 = vector.extract_strided_slice %148 {offsets = [0, 96], sizes = [8, 32], strides = [1, 1]} : vector<8x128xf32> to vector<8x32xf32>
    %154 = arith.mulf %151, %135 : vector<8x32xf32>
    %155 = arith.mulf %150, %152 : vector<8x32xf32>
    %156 = arith.addf %154, %155 : vector<8x32xf32>
    %157 = math.tanh %156 : vector<8x32xf32>
    %158 = arith.mulf %153, %157 : vector<8x32xf32>
    %c56 = arith.constant 56 : index
    %c0_62 = arith.constant 0 : index
    %159 = vector.load %arg10[%c56, %c0_62] : memref<64x128xf32, #tpu.memory_space<vmem>>, vector<8x128xf32>
    %c0_63 = arith.constant 0 : index
    %c0_64 = arith.constant 0 : index
    %160 = vector.load %arg3[%c0_63, %c0_64] : memref<32x128xf32, #tpu.memory_space<vmem>>, vector<32x128xf32>
    %cst_65 = arith.constant dense<0.000000e+00> : vector<8x128xf32>
    %161 = tpu.matmul %158, %160, %cst_65 {dimension_numbers = #tpu.dot_dimension_numbers<[1], [0], [0], [1], [0, 0, 1, 1], [], []>} : vector<8x32xf32>, vector<32x128xf32>, vector<8x128xf32> -> vector<8x128xf32>
    %162 = arith.addf %159, %161 : vector<8x128xf32>
    %cst_66 = arith.constant 5.000000e-01 : f32
    %163 = vector.broadcast %cst_66 : f32 to vector<8x128xf32>
    %164 = arith.mulf %163, %162 : vector<8x128xf32>
    %165 = math.tanh %164 : vector<8x128xf32>
    %cst_67 = arith.constant 1.000000e+00 : f32
    %166 = vector.broadcast %cst_67 : f32 to vector<8x128xf32>
    %167 = arith.addf %165, %166 : vector<8x128xf32>
    %cst_68 = arith.constant 5.000000e-01 : f32
    %168 = vector.broadcast %cst_68 : f32 to vector<8x128xf32>
    %169 = arith.mulf %168, %167 : vector<8x128xf32>
    %170 = math.tanh %162 : vector<8x128xf32>
    %171 = vector.extract_strided_slice %169 {offsets = [0, 0], sizes = [8, 32], strides = [1, 1]} : vector<8x128xf32> to vector<8x32xf32>
    %172 = vector.extract_strided_slice %169 {offsets = [0, 32], sizes = [8, 32], strides = [1, 1]} : vector<8x128xf32> to vector<8x32xf32>
    %173 = vector.extract_strided_slice %170 {offsets = [0, 64], sizes = [8, 32], strides = [1, 1]} : vector<8x128xf32> to vector<8x32xf32>
    %174 = vector.extract_strided_slice %169 {offsets = [0, 96], sizes = [8, 32], strides = [1, 1]} : vector<8x128xf32> to vector<8x32xf32>
    %175 = arith.mulf %172, %156 : vector<8x32xf32>
    %176 = arith.mulf %171, %173 : vector<8x32xf32>
    %177 = arith.addf %175, %176 : vector<8x32xf32>
    %178 = math.tanh %177 : vector<8x32xf32>
    %179 = arith.mulf %174, %178 : vector<8x32xf32>
    %c0_69 = arith.constant 0 : index
    %c0_70 = arith.constant 0 : index
    %180 = vector.load %arg8[%c0_69, %c0_70] : memref<8x32xf32, #tpu.memory_space<vmem>>, vector<8x32xf32>
    tpu.vector_store %arg8[%c0_69, %c0_70], %179 {strides = array<i32>} : memref<8x32xf32, #tpu.memory_space<vmem>>, vector<8x32xf32>,
    %c0_71 = arith.constant 0 : index
    %c0_72 = arith.constant 0 : index
    %181 = vector.load %arg9[%c0_71, %c0_72] : memref<8x32xf32, #tpu.memory_space<vmem>>, vector<8x32xf32>
    tpu.vector_store %arg9[%c0_71, %c0_72], %177 {strides = array<i32>} : memref<8x32xf32, #tpu.memory_space<vmem>>, vector<8x32xf32>,
    %c0_i32_73 = arith.constant 0 : i32
    %182 = arith.cmpi eq, %arg0, %c0_i32_73 : i32
    %183 = arith.extui %182 : i1 to i32
    %c0_i32_74 = arith.constant 0 : i32
    %184 = arith.cmpi ne, %183, %c0_i32_74 : i32
    scf.if %184 {
      %cst_75 = arith.constant 0.000000e+00 : f32
      %185 = vector.broadcast %cst_75 : f32 to vector<8x32xf32>
      %186 = arith.maximumf %179, %185 : vector<8x32xf32>
      %c0_76 = arith.constant 0 : index
      %c0_77 = arith.constant 0 : index
      %187 = vector.load %arg5[%c0_76, %c0_77] : memref<32x128xf32, #tpu.memory_space<vmem>>, vector<32x128xf32>
      %cst_78 = arith.constant dense<0.000000e+00> : vector<8x128xf32>
      %188 = tpu.matmul %186, %187, %cst_78 {dimension_numbers = #tpu.dot_dimension_numbers<[1], [0], [0], [1], [0, 0, 1, 1], [], []>} : vector<8x32xf32>, vector<32x128xf32>, vector<8x128xf32> -> vector<8x128xf32>
      %c0_79 = arith.constant 0 : index
      %c0_80 = arith.constant 0 : index
      %189 = vector.load %arg6[%c0_79, %c0_80] : memref<1x128xf32, #tpu.memory_space<vmem>>, vector<1x128xf32>
      %190 = vector.broadcast %189 : vector<1x128xf32> to vector<8x128xf32>
      %191 = arith.addf %188, %190 : vector<8x128xf32>
      %c0_81 = arith.constant 0 : index
      %c0_82 = arith.constant 0 : index
      %192 = vector.load %arg7[%c0_81, %c0_82] : memref<8x128xf32, #tpu.memory_space<vmem>>, vector<8x128xf32>
      tpu.vector_store %arg7[%c0_81, %c0_82], %191 {strides = array<i32>} : memref<8x128xf32, #tpu.memory_space<vmem>>, vector<8x128xf32>,
    } else {
    }
    return
  }
  func.func @transform_0(%arg0: i32) -> (i32, i32) {
    %c0_i32 = arith.constant 0 : i32
    %c0_i32_0 = arith.constant 0 : i32
    return %arg0, %c0_i32 : i32, i32
  }
  func.func @transform_1(%arg0: i32) -> (i32, i32) {
    %c0_i32 = arith.constant 0 : i32
    %c0_i32_0 = arith.constant 0 : i32
    %c0_i32_1 = arith.constant 0 : i32
    return %c0_i32, %c0_i32_0 : i32, i32
  }
  func.func @transform_2(%arg0: i32) -> (i32, i32) {
    %c0_i32 = arith.constant 0 : i32
    %c0_i32_0 = arith.constant 0 : i32
    %c0_i32_1 = arith.constant 0 : i32
    return %c0_i32, %c0_i32_0 : i32, i32
  }
  func.func @transform_3(%arg0: i32) -> (i32, i32) {
    %c0_i32 = arith.constant 0 : i32
    %c0_i32_0 = arith.constant 0 : i32
    %c0_i32_1 = arith.constant 0 : i32
    return %c0_i32, %c0_i32_0 : i32, i32
  }
  func.func @transform_4(%arg0: i32) -> (i32, i32) {
    %c0_i32 = arith.constant 0 : i32
    %c0_i32_0 = arith.constant 0 : i32
    %c0_i32_1 = arith.constant 0 : i32
    return %c0_i32, %c0_i32_0 : i32, i32
  }
  func.func @transform_5(%arg0: i32) -> (i32, i32) {
    %c0_i32 = arith.constant 0 : i32
    %c0_i32_0 = arith.constant 0 : i32
    %c0_i32_1 = arith.constant 0 : i32
    return %c0_i32, %c0_i32_0 : i32, i32
  }
  func.func @transform_6(%arg0: i32) -> (i32, i32) {
    %c0_i32 = arith.constant 0 : i32
    %c0_i32_0 = arith.constant 0 : i32
    %c0_i32_1 = arith.constant 0 : i32
    return %c0_i32, %c0_i32_0 : i32, i32
  }
}

</mosaic_0001>

<bundles_post_ra>
// kernel: lstm_net_forward.1
= control target key start
LH: loop header
LB: loop body
LE: loop exit
PB: predicated region body
PF: predicated region fallthrough
CT: control target
= control target key end

     0   :  { %v1367_v3 = vmov 0.0   ;;  %vm48_vm0 = vcmask 130048   ;;  %vm28_vm1 = vcmask 261120   ;;  %s1644_s0 = inlined_call_operand.vmem [shape: f32[64,16], index: 0, kind: input, shape index: {}]   ;;  %s1645_s1 = inlined_call_operand.vmem [shape: f32[16,128], index: 1, kind: input, shape index: {}]   ;;  %s1646_s2 = inlined_call_operand.vmem [shape: f32[32,128], index: 2, kind: input, shape index: {}]   ;;  %s1647_s3 = inlined_call_operand.vmem [shape: f32[1,128], index: 3, kind: input, shape index: {}]   ;;  %s1648_s4 = inlined_call_operand.vmem [shape: f32[32,128], index: 4, kind: input, shape index: {}]   ;;  %s1649_s5 = inlined_call_operand.vmem [shape: f32[1,128], index: 5, kind: input, shape index: {}]   ;;  %s1650_s6 = inlined_call_operand.hbm [shape: f32[8,128], index: 6, kind: output, shape index: {}]  }
   0x1   :  { %v40_v0 = vld [vmem:[%s1645_s1 + $0x8] sm:$0xff]  ;;  %v1414_v1 = vld [vmem:[%s1646_s2 + $0x18] sm:$0xff]  ;;  %v39_v2 = vld [vmem:[%s1645_s1] sm:$0xff]  ;;  %1192 = vmatprep.subr.mxu1 %v1367_v3  ;;  %29 = vst.msk [vmem:[#allocation2] sm:$0xff] %vm28_vm1, %v1367_v3 }
   0x2   :  { %1176 = vmatprep.subr.mxu0 %v40_v0  ;;  %v31_v4 = vld [vmem:[%s1644_s0] sm:$0xff]  ;;  %1193 = vmatpush3.msra.mxu1 %v1414_v1  ;;  %v1427_v5 = vld [vmem:[%s1646_s2 + $0x10] sm:$0xff]  ;;  %v32_v6 = vld [vmem:[%s1644_s0 + $0x8] sm:$0xff]  ;;  %30 = vst.msk [vmem:[#allocation3] sm:$0xff] %vm28_vm1, %v1367_v3 }
   0x3   :  { %1177 = vmatpush3.msra.mxu0 %v40_v0 }
   0x4   :  { %11 = vsyncpa [#allocation6], 0  ;;  %1178 = vmatprep.subr.mxu0 %v39_v2  ;;  %1194 = vmatprep.subr.mxu1 %v1367_v3  ;;  %v1441_v7 = vld [vmem:[%s1646_s2 + $0x8] sm:$0xff]  ;;  %v1449_v8 = vld [vmem:[%s1646_s2] sm:$0xff]  ;;  %vm1368_vm2 = vmmov 0   ;;  %s1369_s13 = smov 64  }
   0x5   :  { %1179 = vmatpush3.msra.mxu0 %v39_v2  ;;  %1180 = vmatprep.mubr.msk.f32.mxu0 %vm48_vm0, %v31_v4  ;;  %v1480_v11 = vld [vmem:[%s1647_s3] ss:$0 sm:$0xff]  ;;  %s1370_s14 = smov 32   ;;  %v33_v47 = vld [vmem:[%s1644_s0 + $0x10] sm:$0xff]  ;;  %v34_v48 = vld [vmem:[%s1644_s0 + $0x18] sm:$0xff]  ;;  %s1371_s8 = smov 96  }
   0x6   :  { %1195 = vmatpush3.msra.mxu1 %v1427_v5  ;;  %1181 = vmatmul.mubr.msk.f32.vlgmr.msra.gmra.mxu0 %vm48_vm0, %v32_v6  ;;  %v35_v49 = vld [vmem:[%s1644_s0 + $0x20] sm:$0xff]  ;;  %v36_v50 = vld [vmem:[%s1644_s0 + $0x28] sm:$0xff]  ;;  %v37_v51 = vld [vmem:[%s1644_s0 + $0x30] sm:$0xff]  ;;  %s1372_s10 = smov [#allocation5]  }
   0x7   :  { %1196 = vmatprep.subr.mxu1 %v1367_v3  ;;  %1200 = vmatprep.mubr.msk.f32.mxu1 %vm1368_vm2, %v1367_v3  ;;  %v38_v52 = vld [vmem:[%s1644_s0 + $0x38] sm:$0xff]  ;;  %s1094_s11 = sshll.u32 %s1372_s10, 4  ;;  %s1095_s11 = int_to_ptr.vmem [resolvable:$true] %s1094_s11 }
   0x8   :  { %1197 = vmatpush3.msra.mxu1 %v1441_v7  ;;  %1214 = vmatprep.subr.mxu0 %v1367_v3  ;;  %v186_v9 = vld [vmem:[#allocation2] sm:$0xff]  ;;  %s1345_s2 = scalar_lea.vmem %s1095_s11, 128  ;;  %p1350_p1 = scmp.lt.s32.totalorder %s1095_s11, %s1095_s11 }
   0x9   :  { %1198 = vmatprep.subr.mxu1 %v1367_v3  ;;  %1215 = vmatpush3.msra.mxu0 %v1414_v1  ;;  %v187_v18 = vld [vmem:[#allocation3] sm:$0xff]  ;;  %p1346_p0 = scmp.ne.s32.totalorder %s1095_s11, %s1345_s2  ;;  %p1351_p2 = scmp.lt.s32.totalorder %s1345_s2, %s1345_s2 }
   0xa   :  { %1199 = vmatpush3.msra.mxu1 %v1449_v8  ;;  %1216 = vmatprep.subr.mxu0 %v1367_v3 }
   0xb   :  { %1201 = vmatmul.mubr.msk.f32.vlgmr.msra.gmra.mxu1 %vm28_vm1, %v186_v9  ;;  %1203 = vmatprep.subr.mxu1 %v1367_v3  ;;  %p1352_p3 = por %p1351_p2, %p1350_p1 }
   0xc   :  { %1204 = vmatpush3.msra.mxu1 %v1414_v1  ;;  %1211 = vmatprep.mubr.msk.f32.mxu1 %vm1368_vm2, %v1367_v3 }
   0xd   :  { %1205 = vmatprep.subr.mxu1 %v1367_v3  ;;  %1217 = vmatpush3.msra.mxu0 %v1427_v5  ;;  %p1353_p4 = pnand %p1352_p3, %p1346_p0 }
   0xe   :  { %1206 = vmatpush3.msra.mxu1 %v1427_v5  ;;  %1218 = vmatprep.subr.mxu0 %v1367_v3 }
   0xf   :  { %1207 = vmatprep.subr.mxu1 %v1367_v3  ;;  %1219 = vmatpush3.msra.mxu0 %v1441_v7 }
  0x10   :  { %1208 = vmatpush3.msra.mxu1 %v1441_v7  ;;  %1220 = vmatprep.subr.mxu0 %v1367_v3 }
  0x11   :  { %1209 = vmatprep.subr.mxu1 %v1367_v3  ;;  %1221 = vmatpush3.msra.mxu0 %v1449_v8 }
  0x12   :  { %1210 = vmatpush3.msra.mxu1 %v1449_v8  ;;  %1236 = vmatprep.subr.mxu0 %v1367_v3 }
  0x13   :  { %1225 = vmatprep.subr.mxu1 %v1367_v3  ;;  %1183 = vmatprep.mubr.msk.f32.mxu0 %vm48_vm0, %v33_v47 }
  0x14   :  { %1184 = vmatmul.mubr.msk.f32.gmra.mxu0 %vm48_vm0, %v34_v48 }
  0x15   :  { %1186 = vmatprep.mubr.msk.f32.mxu0 %vm48_vm0, %v35_v49 }
  0x18   :  { %1187 = vmatmul.mubr.msk.f32.gmra.mxu0 %vm48_vm0, %v36_v50 }
  0x19   :  { %1189 = vmatprep.mubr.msk.f32.mxu0 %vm48_vm0, %v37_v51 }
  0x1c   :  { %1190 = vmatmul.mubr.msk.f32.gmra.mxu0 %vm48_vm0, %v38_v52 }
  0x1d   :  { %1222 = vmatprep.mubr.msk.f32.mxu0 %vm1368_vm2, %v1367_v3 }
  0xc6   :  { %v1182_v10 = vpop.f32.mrf.mxu0 }
  0xc7   :  { %v145_v33 = vadd.f32 %v1182_v10, %v1480_v11 }
  0xc8   :  { %v139_v12 = vpop.f32.mrf.mxu0 }
  0xc9   :  { %v140_v13 = vadd.f32 %v1480_v11, %v139_v12 }
  0xcb   :  { %v263_v14 = vpop.f32.mrf.mxu1 }
  0xcc   :  { %v267_v15 = vadd.f32 %v263_v14, %v140_v13 }
  0xcd   :  { %v1202_v16 = vpop.f32.mrf.mxu1 }
  0xce   :  { %1297 = vtanh.f32 %v267_v15  ;;  %v268_v19 = vmul.f32 0.5, %v267_v15 }
  0xd0   :  { %1299 = vtanh.f32 %v268_v19 }
  0xd4   :  { %v1185_v57 = vpop.f32.mrf.mxu0 }
  0xd6   :  { %v149_v58 = vpop.f32.mrf.mxu0 }
  0xd7   :  { %v150_v63 = vadd.f32 %v1480_v11, %v149_v58 }
  0xd8   :  { %v1541_v59 = vpop.f32.mrf.mxu0 }
  0xda   :  { %v1543_v60 = vpop.f32.mrf.mxu0 }
  0xdb   :  { %v1298_v17 = vpop.eup %1297 }
  0xdc   :  { %279 = vrot.lane.b32.xlu0 %v1298_v17, %s1369_s13  ;;  %v1545_v61 = vpop.f32.mrf.mxu0 }
  0xdd   :  { %v1300_v20 = vpop.eup %1299 }
  0xde   :  { %v270_v21 = vadd.f32 1.0, %v1300_v20  ;;  %v1547_v62 = vpop.f32.mrf.mxu0 }
  0xe0   :  { %274 = vrot.lane.b32.xlu0 %v187_v18, %s1370_s14  ;;  %v271_v22 = vmul.f32 0.5, %v270_v21 }
 0x14e   :  { %v280_v23 = vpop.permute.xlu0 %279 }
 0x14f   :  { %v282_v24 = vmul.f32 %v280_v23, %v271_v22  ;;  %v155_v23 = vadd.f32 %v1185_v57, %v1480_v11 }
 0x151   :  { %284 = vrot.lane.b32.xlu1 %v282_v24, %s1370_s14 }
 0x152   :  { %v275_v25 = vpop.permute.xlu0 %274 }
 0x153   :  { %v277_v26 = vmul.f32 %v275_v25, %v271_v22 }
 0x1c3   :  { %v285_v27 = vpop.permute.xlu1 %284 }
 0x1c4   :  { %v287_v28 = vadd.f32 %v285_v27, %v277_v26 }
 0x1c6   :  { %1301 = vtanh.f32 %v287_v28 }
 0x1d3   :  { %v1302_v29 = vpop.eup %1301 }
 0x1d4   :  { %290 = vrot.lane.b32.xlu1 %v1302_v29, %s1369_s13 }
 0x246   :  { %v291_v30 = vpop.permute.xlu1 %290 }
 0x247   :  { %v293_v31 = vmul.f32 %v291_v30, %v271_v22 }
 0x249   :  { %296 = vrot.lane.b32.xlu0 %v293_v31, %s1370_s14 }
 0x2bb   :  { %v297_v32 = vpop.permute.xlu0 %296 }
 0x2bc   :  { %1212 = vmatmul.mubr.msk.f32.vlgmr.msra.gmra.mxu1 %vm28_vm1, %v297_v32 }
 0x2bd   :  { %1226 = vmatpush3.msra.mxu1 %v1414_v1  ;;  %1233 = vmatprep.mubr.msk.f32.mxu1 %vm1368_vm2, %v1367_v3 }
 0x2be   :  { %1227 = vmatprep.subr.mxu1 %v1367_v3 }
 0x2bf   :  { %1228 = vmatpush3.msra.mxu1 %v1427_v5 }
 0x2c0   :  { %1229 = vmatprep.subr.mxu1 %v1367_v3 }
 0x2c1   :  { %1230 = vmatpush3.msra.mxu1 %v1441_v7 }
 0x2c2   :  { %1231 = vmatprep.subr.mxu1 %v1367_v3 }
 0x2c3   :  { %1232 = vmatpush3.msra.mxu1 %v1449_v8 }
 0x2c4   :  { %1247 = vmatprep.subr.mxu1 %v1367_v3 }
 0x37c   :  { %v366_v34 = vpop.f32.mrf.mxu1 }
 0x37d   :  { %v370_v35 = vadd.f32 %v366_v34, %v145_v33 }
 0x37e   :  { %v1213_v36 = vpop.f32.mrf.mxu1 }
 0x37f   :  { %1303 = vtanh.f32 %v370_v35  ;;  %v371_v38 = vmul.f32 0.5, %v370_v35 }
 0x381   :  { %1305 = vtanh.f32 %v371_v38 }
 0x38c   :  { %v1304_v37 = vpop.eup %1303 }
 0x38d   :  { %378 = vrot.lane.b32.xlu1 %v1304_v37, %s1369_s13 }
 0x38e   :  { %v1306_v39 = vpop.eup %1305 }
 0x38f   :  { %v373_v40 = vadd.f32 1.0, %v1306_v39 }
 0x391   :  { %v374_v41 = vmul.f32 0.5, %v373_v40 }
 0x393   :  { %v376_v44 = vmul.f32 %v374_v41, %v287_v28 }
 0x3ff   :  { %v379_v42 = vpop.permute.xlu1 %378 }
 0x400   :  { %v381_v43 = vmul.f32 %v379_v42, %v374_v41 }
 0x402   :  { %383 = vrot.lane.b32.xlu0 %v381_v43, %s1370_s14 }
 0x474   :  { %v384_v45 = vpop.permute.xlu0 %383 }
 0x475   :  { %v386_v46 = vadd.f32 %v384_v45, %v376_v44 }
 0x477   :  { %1307 = vtanh.f32 %v386_v46 }
 0x484   :  { %v1308_v53 = vpop.eup %1307 }
 0x485   :  { %389 = vrot.lane.b32.xlu1 %v1308_v53, %s1369_s13 }
 0x4f7   :  { %v390_v54 = vpop.permute.xlu1 %389 }
 0x4f8   :  { %v392_v55 = vmul.f32 %v390_v54, %v374_v41  ;;  %v160_v41 = vadd.f32 %v1480_v11, %v1543_v60  ;;  %v165_v60 = vadd.f32 %v1541_v59, %v1480_v11 }
 0x4fa   :  { %395 = vrot.lane.b32.xlu0 %v392_v55, %s1370_s14 }
 0x56c   :  { %v396_v56 = vpop.permute.xlu0 %395 }
 0x56d   :  { %1223 = vmatmul.mubr.msk.f32.vlgmr.msra.gmra.mxu0 %vm28_vm1, %v396_v56 }
 0x56e   :  { %1237 = vmatpush3.msra.mxu0 %v1414_v1  ;;  %1244 = vmatprep.mubr.msk.f32.mxu0 %vm1368_vm2, %v1367_v3 }
 0x56f   :  { %1238 = vmatprep.subr.mxu0 %v1367_v3 }
 0x570   :  { %1239 = vmatpush3.msra.mxu0 %v1427_v5 }
 0x571   :  { %1240 = vmatprep.subr.mxu0 %v1367_v3 }
 0x572   :  { %1241 = vmatpush3.msra.mxu0 %v1441_v7 }
 0x573   :  { %1242 = vmatprep.subr.mxu0 %v1367_v3 }
 0x574   :  { %1243 = vmatpush3.msra.mxu0 %v1449_v8 }
 0x575   :  { %1258 = vmatprep.subr.mxu0 %v1367_v3 }
 0x62d   :  { %v465_v0 = vpop.f32.mrf.mxu0 }
 0x62e   :  { %v469_v2 = vadd.f32 %v465_v0, %v150_v63 }
 0x62f   :  { %v1224_v4 = vpop.f32.mrf.mxu0 }
 0x630   :  { %1309 = vtanh.f32 %v469_v2  ;;  %v470_v9 = vmul.f32 0.5, %v469_v2 }
 0x632   :  { %1311 = vtanh.f32 %v470_v9 }
 0x63d   :  { %v1310_v6 = vpop.eup %1309 }
 0x63e   :  { %477 = vrot.lane.b32.xlu1 %v1310_v6, %s1369_s13 }
 0x63f   :  { %v1312_v10 = vpop.eup %1311 }
 0x640   :  { %v472_v12 = vadd.f32 1.0, %v1312_v10 }
 0x642   :  { %v473_v13 = vmul.f32 0.5, %v472_v12 }
 0x644   :  { %v475_v16 = vmul.f32 %v473_v13, %v386_v46 }
 0x6b0   :  { %v478_v14 = vpop.permute.xlu1 %477 }
 0x6b1   :  { %v480_v15 = vmul.f32 %v478_v14, %v473_v13 }
 0x6b3   :  { %482 = vrot.lane.b32.xlu0 %v480_v15, %s1370_s14 }
 0x725   :  { %v483_v17 = vpop.permute.xlu0 %482 }
 0x726   :  { %v485_v18 = vadd.f32 %v483_v17, %v475_v16  ;;  %v170_v17 = vadd.f32 %v1480_v11, %v1547_v62 }
 0x728   :  { %1313 = vtanh.f32 %v485_v18 }
 0x735   :  { %v1314_v19 = vpop.eup %1313 }
 0x736   :  { %488 = vrot.lane.b32.xlu1 %v1314_v19, %s1369_s13 }
 0x7a8   :  { %v489_v20 = vpop.permute.xlu1 %488 }
 0x7a9   :  { %v491_v21 = vmul.f32 %v489_v20, %v473_v13 }
 0x7ab   :  { %494 = vrot.lane.b32.xlu0 %v491_v21, %s1370_s14 }
 0x81d   :  { %v495_v22 = vpop.permute.xlu0 %494 }
 0x81e   :  { %1234 = vmatmul.mubr.msk.f32.vlgmr.msra.gmra.mxu1 %vm28_vm1, %v495_v22 }
 0x81f   :  { %1248 = vmatpush3.msra.mxu1 %v1414_v1  ;;  %1255 = vmatprep.mubr.msk.f32.mxu1 %vm1368_vm2, %v1367_v3 }
 0x820   :  { %1249 = vmatprep.subr.mxu1 %v1367_v3 }
 0x821   :  { %1250 = vmatpush3.msra.mxu1 %v1427_v5 }
 0x822   :  { %1251 = vmatprep.subr.mxu1 %v1367_v3 }
 0x823   :  { %1252 = vmatpush3.msra.mxu1 %v1441_v7 }
 0x824   :  { %1253 = vmatprep.subr.mxu1 %v1367_v3 }
 0x825   :  { %1254 = vmatpush3.msra.mxu1 %v1449_v8 }
 0x826   :  { %1269 = vmatprep.subr.mxu1 %v1367_v3 }
 0x8de   :  { %v564_v24 = vpop.f32.mrf.mxu1 }
 0x8df   :  { %v568_v25 = vadd.f32 %v564_v24, %v155_v23 }
 0x8e0   :  { %v1235_v26 = vpop.f32.mrf.mxu1 }
 0x8e1   :  { %1315 = vtanh.f32 %v568_v25  ;;  %v569_v28 = vmul.f32 0.5, %v568_v25 }
 0x8e3   :  { %1317 = vtanh.f32 %v569_v28 }
 0x8ee   :  { %v1316_v27 = vpop.eup %1315 }
 0x8ef   :  { %576 = vrot.lane.b32.xlu1 %v1316_v27, %s1369_s13 }
 0x8f0   :  { %v1318_v29 = vpop.eup %1317 }
 0x8f1   :  { %v571_v30 = vadd.f32 1.0, %v1318_v29 }
 0x8f3   :  { %v572_v31 = vmul.f32 0.5, %v571_v30 }
 0x8f5   :  { %v574_v34 = vmul.f32 %v572_v31, %v485_v18 }
 0x961   :  { %v577_v32 = vpop.permute.xlu1 %576 }
 0x962   :  { %v579_v33 = vmul.f32 %v577_v32, %v572_v31 }
 0x964   :  { %581 = vrot.lane.b32.xlu0 %v579_v33, %s1370_s14 }
 0x9d6   :  { %v582_v35 = vpop.permute.xlu0 %581 }
 0x9d7   :  { %v584_v36 = vadd.f32 %v582_v35, %v574_v34  ;;  %v175_v34 = vadd.f32 %v1545_v61, %v1480_v11  ;;  %v1004_v11 = vld [vmem:[%s1648_s4 + $0x18] sm:$0xff]  ;;  %v1003_v61 = vld [vmem:[%s1648_s4 + $0x10] sm:$0xff] }
 0x9d9   :  { %1319 = vtanh.f32 %v584_v36 }
 0x9e6   :  { %v1320_v37 = vpop.eup %1319 }
 0x9e7   :  { %587 = vrot.lane.b32.xlu1 %v1320_v37, %s1369_s13 }
 0xa59   :  { %v588_v38 = vpop.permute.xlu1 %587 }
 0xa5a   :  { %v590_v39 = vmul.f32 %v588_v38, %v572_v31 }
 0xa5c   :  { %593 = vrot.lane.b32.xlu0 %v590_v39, %s1370_s14 }
 0xace   :  { %v594_v40 = vpop.permute.xlu0 %593 }
 0xacf   :  { %1245 = vmatmul.mubr.msk.f32.vlgmr.msra.gmra.mxu0 %vm28_vm1, %v594_v40 }
 0xad0   :  { %1259 = vmatpush3.msra.mxu0 %v1414_v1  ;;  %1266 = vmatprep.mubr.msk.f32.mxu0 %vm1368_vm2, %v1367_v3 }
 0xad1   :  { %1260 = vmatprep.subr.mxu0 %v1367_v3 }
 0xad2   :  { %1261 = vmatpush3.msra.mxu0 %v1427_v5 }
 0xad3   :  { %1262 = vmatprep.subr.mxu0 %v1367_v3 }
 0xad4   :  { %1263 = vmatpush3.msra.mxu0 %v1441_v7 }
 0xad5   :  { %1264 = vmatprep.subr.mxu0 %v1367_v3 }
 0xad6   :  { %1265 = vmatpush3.msra.mxu0 %v1449_v8 }
 0xad7   :  { %1280 = vmatprep.subr.mxu0 %v1367_v3 }
 0xb8f   :  { %v663_v42 = vpop.f32.mrf.mxu0 }
 0xb90   :  { %v667_v43 = vadd.f32 %v663_v42, %v160_v41 }
 0xb91   :  { %v1246_v44 = vpop.f32.mrf.mxu0 }
 0xb92   :  { %1321 = vtanh.f32 %v667_v43  ;;  %v668_v46 = vmul.f32 0.5, %v667_v43 }
 0xb94   :  { %1323 = vtanh.f32 %v668_v46 }
 0xb9f   :  { %v1322_v45 = vpop.eup %1321 }
 0xba0   :  { %675 = vrot.lane.b32.xlu1 %v1322_v45, %s1369_s13 }
 0xba1   :  { %v1324_v47 = vpop.eup %1323 }
 0xba2   :  { %v670_v48 = vadd.f32 1.0, %v1324_v47 }
 0xba4   :  { %v671_v49 = vmul.f32 0.5, %v670_v48  ;;  %v1002_v48 = vld [vmem:[%s1648_s4 + $0x8] sm:$0xff] }
 0xba6   :  { %v673_v52 = vmul.f32 %v671_v49, %v584_v36 }
 0xc12   :  { %v676_v50 = vpop.permute.xlu1 %675 }
 0xc13   :  { %v678_v51 = vmul.f32 %v676_v50, %v671_v49  ;;  %v1001_v50 = vld [vmem:[%s1648_s4] sm:$0xff] }
 0xc15   :  { %680 = vrot.lane.b32.xlu0 %v678_v51, %s1370_s14 }
 0xc87   :  { %v681_v53 = vpop.permute.xlu0 %680 }
 0xc88   :  { %v683_v54 = vadd.f32 %v681_v53, %v673_v52 }
 0xc8a   :  { %1325 = vtanh.f32 %v683_v54 }
 0xc97   :  { %v1326_v55 = vpop.eup %1325 }
 0xc98   :  { %686 = vrot.lane.b32.xlu1 %v1326_v55, %s1369_s13 }
 0xd0a   :  { %v687_v56 = vpop.permute.xlu1 %686 }
 0xd0b   :  { %v689_v57 = vmul.f32 %v687_v56, %v671_v49  ;;  %v1119_v56 = vld [vmem:[%s1649_s5] ss:$0 sm:$0xff] }
 0xd0d   :  { %692 = vrot.lane.b32.xlu0 %v689_v57, %s1370_s14 }
 0xd7f   :  { %v693_v58 = vpop.permute.xlu0 %692 }
 0xd80   :  { %1256 = vmatmul.mubr.msk.f32.vlgmr.msra.gmra.mxu1 %vm28_vm1, %v693_v58 }
 0xd81   :  { %1270 = vmatpush3.msra.mxu1 %v1414_v1  ;;  %1277 = vmatprep.mubr.msk.f32.mxu1 %vm1368_vm2, %v1367_v3 }
 0xd82   :  { %1271 = vmatprep.subr.mxu1 %v1367_v3 }
 0xd83   :  { %1272 = vmatpush3.msra.mxu1 %v1427_v5 }
 0xd84   :  { %1273 = vmatprep.subr.mxu1 %v1367_v3 }
 0xd85   :  { %1274 = vmatpush3.msra.mxu1 %v1441_v7 }
 0xd86   :  { %1275 = vmatprep.subr.mxu1 %v1367_v3 }
 0xd87   :  { %1276 = vmatpush3.msra.mxu1 %v1449_v8 }
 0xe40   :  { %v762_v63 = vpop.f32.mrf.mxu1 }
 0xe41   :  { %v766_v1 = vadd.f32 %v762_v63, %v165_v60 }
 0xe42   :  { %v1257_v0 = vpop.f32.mrf.mxu1 }
 0xe43   :  { %1327 = vtanh.f32 %v766_v1  ;;  %v767_v4 = vmul.f32 0.5, %v766_v1 }
 0xe45   :  { %1329 = vtanh.f32 %v767_v4 }
 0xe50   :  { %v1328_v2 = vpop.eup %1327 }
 0xe51   :  { %774 = vrot.lane.b32.xlu1 %v1328_v2, %s1369_s13 }
 0xe52   :  { %v1330_v5 = vpop.eup %1329 }
 0xe53   :  { %v769_v6 = vadd.f32 1.0, %v1330_v5 }
 0xe55   :  { %v770_v9 = vmul.f32 0.5, %v769_v6 }
 0xe57   :  { %v772_v8 = vmul.f32 %v770_v9, %v683_v54 }
 0xec3   :  { %v775_v7 = vpop.permute.xlu1 %774 }
 0xec4   :  { %v777_v10 = vmul.f32 %v775_v7, %v770_v9 }
 0xec6   :  { %779 = vrot.lane.b32.xlu0 %v777_v10, %s1370_s14 }
 0xf38   :  { %v780_v12 = vpop.permute.xlu0 %779 }
 0xf39   :  { %v782_v13 = vadd.f32 %v780_v12, %v772_v8 }
 0xf3b   :  { %1331 = vtanh.f32 %v782_v13 }
 0xf48   :  { %v1332_v59 = vpop.eup %1331 }
 0xf49   :  { %785 = vrot.lane.b32.xlu1 %v1332_v59, %s1369_s13 }
 0xfbb   :  { %v786_v14 = vpop.permute.xlu1 %785 }
 0xfbc   :  { %v788_v15 = vmul.f32 %v786_v14, %v770_v9 }
 0xfbe   :  { %791 = vrot.lane.b32.xlu0 %v788_v15, %s1370_s14 }
0x1030   :  { %v792_v16 = vpop.permute.xlu0 %791 }
0x1031   :  { %1267 = vmatmul.mubr.msk.f32.vlgmr.msra.gmra.mxu0 %vm28_vm1, %v792_v16 }
0x1032   :  { %1288 = vmatprep.mubr.msk.f32.mxu0 %vm1368_vm2, %v1367_v3  ;;  %1281 = vmatpush3.msra.mxu0 %v1004_v11 }
0x1033   :  { %1282 = vmatprep.subr.mxu0 %v1367_v3 }
0x1034   :  { %1283 = vmatpush3.msra.mxu0 %v1003_v61 }
0x1035   :  { %1284 = vmatprep.subr.mxu0 %v1367_v3 }
0x1036   :  { %1285 = vmatpush3.msra.mxu0 %v1002_v48 }
0x1037   :  { %1286 = vmatprep.subr.mxu0 %v1367_v3 }
0x1038   :  { %1287 = vmatpush3.msra.mxu0 %v1001_v50 }
0x10f1   :  { %v861_v18 = vpop.f32.mrf.mxu0 }
0x10f2   :  { %v865_v19 = vadd.f32 %v861_v18, %v170_v17 }
0x10f3   :  { %v1268_v20 = vpop.f32.mrf.mxu0 }
0x10f4   :  { %1333 = vtanh.f32 %v865_v19  ;;  %v866_v22 = vmul.f32 0.5, %v865_v19 }
0x10f6   :  { %1335 = vtanh.f32 %v866_v22 }
0x1101   :  { %v1334_v21 = vpop.eup %1333 }
0x1102   :  { %873 = vrot.lane.b32.xlu1 %v1334_v21, %s1369_s13 }
0x1103   :  { %v1336_v23 = vpop.eup %1335 }
0x1104   :  { %v868_v24 = vadd.f32 1.0, %v1336_v23 }
0x1106   :  { %v869_v25 = vmul.f32 0.5, %v868_v24 }
0x1108   :  { %v871_v28 = vmul.f32 %v869_v25, %v782_v13 }
0x1174   :  { %v874_v26 = vpop.permute.xlu1 %873 }
0x1175   :  { %v876_v27 = vmul.f32 %v874_v26, %v869_v25 }
0x1177   :  { %878 = vrot.lane.b32.xlu0 %v876_v27, %s1370_s14 }
0x11e9   :  { %v879_v29 = vpop.permute.xlu0 %878 }
0x11ea   :  { %v881_v30 = vadd.f32 %v879_v29, %v871_v28 }
0x11ec   :  { %1337 = vtanh.f32 %v881_v30 }
0x11f9   :  { %v1338_v62 = vpop.eup %1337 }
0x11fa   :  { %884 = vrot.lane.b32.xlu1 %v1338_v62, %s1369_s13 }
0x126c   :  { %v885_v31 = vpop.permute.xlu1 %884 }
0x126d   :  { %v887_v32 = vmul.f32 %v885_v31, %v869_v25 }
0x126f   :  { %890 = vrot.lane.b32.xlu0 %v887_v32, %s1370_s14 }
0x12e1   :  { %v891_v33 = vpop.permute.xlu0 %890 }
0x12e2   :  { %1278 = vmatmul.mubr.msk.f32.vlgmr.msra.gmra.mxu1 %vm28_vm1, %v891_v33 }
0x13a2   :  { %v960_v35 = vpop.f32.mrf.mxu1 }
0x13a3   :  { %v964_v36 = vadd.f32 %v960_v35, %v175_v34 }
0x13a4   :  { %v1279_v37 = vpop.f32.mrf.mxu1 }
0x13a5   :  { %1339 = vtanh.f32 %v964_v36  ;;  %v965_v39 = vmul.f32 0.5, %v964_v36 }
0x13a7   :  { %1341 = vtanh.f32 %v965_v39 }
0x13b2   :  { %v1340_v38 = vpop.eup %1339 }
0x13b3   :  { %972 = vrot.lane.b32.xlu1 %v1340_v38, %s1369_s13 }
0x13b4   :  { %v1342_v40 = vpop.eup %1341 }
0x13b5   :  { %v967_v41 = vadd.f32 1.0, %v1342_v40 }
0x13b7   :  { %v968_v42 = vmul.f32 0.5, %v967_v41 }
0x13b9   :  { %v970_v45 = vmul.f32 %v968_v42, %v881_v30 }
0x1425   :  { %v973_v43 = vpop.permute.xlu1 %972 }
0x1426   :  { %v975_v44 = vmul.f32 %v973_v43, %v968_v42 }
0x1428   :  { %977 = vrot.lane.b32.xlu0 %v975_v44, %s1370_s14 }
0x149a   :  { %v978_v46 = vpop.permute.xlu0 %977 }
0x149b   :  { %v980_v47 = vadd.f32 %v978_v46, %v970_v45 }
0x149d   :  { %1343 = vtanh.f32 %v980_v47 }
0x14aa   :  { %v1344_v49 = vpop.eup %1343 }
0x14ab   :  { %983 = vrot.lane.b32.xlu1 %v1344_v49, %s1369_s13 }
0x151d   :  { %v984_v51 = vpop.permute.xlu1 %983 }
0x151e   :  { %v986_v52 = vmul.f32 %v984_v51, %v968_v42 }
0x1520   :  { %v1000_v53 = vmax.f32 %v986_v52, 0.0  ;;  %988 = vrot.lane.b32.xlu1 %v986_v52, %s1370_s14 }
0x1522   :  { %1013 = vrot.lane.b32.xlu0 %v1000_v53, %s1370_s14 }
0x1526   :  { %993 = vrot.lane.b32.xlu0 %v980_v47, %s1371_s8 }
0x1592   :  { %v989_v54 = vpop.permute.xlu1 %988 }
0x1593   :  { %991 = vst.msk [vmem:[#allocation2] sm:$0xff] %vm28_vm1, %v989_v54 }
0x1594   :  { %v1014_v55 = vpop.permute.xlu0 %1013 }
0x1595   :  { %1289 = vmatmul.mubr.msk.f32.vlgmr.msra.gmra.mxu0 %vm28_vm1, %v1014_v55 }
0x1598   :  { %v994_v3 = vpop.permute.xlu0 %993 }
0x1599   :  { %996 = vst.msk [vmem:[#allocation3] sm:$0xff] %vm28_vm1, %v994_v3 }
0x1655   :  { %v1083_v57 = vpop.f32.mrf.mxu0 }
0x1656   :  { %v1084_v58 = vadd.f32 %v1119_v56, %v1083_v57 }
0x1657   :  { %v1290_v60 = vpop.f32.mrf.mxu0 }
0x1658   :  { %1087 = vst [vmem:[#allocation5] sm:$0xff] %v1084_v58 }
0x1659   :  { %1356 = shalt.err (!%p1353_p4)
}
0x165a   :  { %1097 = dma.vmem_to_hbm [thread:$0]  %s1095_s11, 128, %s1650_s6, [#allocation6]  }
0x165b   :  { %1365 = dma.done.wait [#allocation6], 128  }
0x165c   :  { %1366 = vsyncadd [#allocation6], 4294967168 }
0x165d   :  { %1101 = vsyncpa [#allocation6], 1 }

</bundles_post_ra>
